<compile_context>
chip_gen: v6e
topology: v6e:2x2x1
jax: 0.10.0
libtpu: 0.0.40
codegen_flags: <defaults>
</compile_context>

<pallas_src>
import jax
import jax.numpy as jnp
from jax.experimental import pallas as pl
from jax.experimental.pallas import tpu as pltpu

LANE = 128  # padded width of the final layer (lane-dense output)


def mlp_kernel(emb_proj_ref, feat_ref, w1f_ref, b1_ref, w2_ref, b2_ref,
               w3_ref, b3_ref, o_ref):
    # emb_proj is the already-projected user embedding (user_emb @ w1_emb),
    # so layer 1 is: relu(feat @ w1_feat + emb_proj + b1).
    h1 = jnp.dot(feat_ref[...], w1f_ref[...],
                 preferred_element_type=jnp.float32)
    h1 = jnp.maximum(h1 + emb_proj_ref[...] + b1_ref[...], 0.0)   # (TB, 64)
    h2 = jnp.dot(h1, w2_ref[...], preferred_element_type=jnp.float32)
    h2 = jnp.maximum(h2 + b2_ref[...], 0.0)                        # (TB, 32)
    h3 = jnp.dot(h2, w3_ref[...], preferred_element_type=jnp.float32)
    o_ref[...] = (h3 + b3_ref[...]).astype(o_ref.dtype)            # (TB, 128)


def net_forward(user_ids, movie_features, params, *, tb=None):
    """Forward pass of Net.

    user_ids:        (B,) int32
    movie_features:  (B, F) float32
    returns:         (B, 1) float32
    """
    emb_table = params["user_embedding"]          # (num_users, E)
    w1, b1 = params["w1"], params["b1"]           # (E+F, 64), (1, 64)
    w2, b2 = params["w2"], params["b2"]           # (64, 32),  (1, 32)
    w3, b3 = params["w3"], params["b3"]           # (32, 1),   (1, 1)

    B, F = movie_features.shape
    E = emb_table.shape[1]

    # Fold the tiny user-embedding contraction offline: one (num_users, 64)
    # table instead of an E-contraction per batch row; gather per row in JAX.
    w1_emb, w1_feat = w1[:E, :], w1[E:, :]
    emb_proj_table = emb_table @ w1_emb                             # (U, 64)
    emb_proj = jnp.take(emb_proj_table, user_ids, axis=0)           # (B, 64)

    # Lane-dense final layer: zero-pad (32, 1) -> (32, 128), (1,1) -> (1,128).
    w3p = jnp.zeros((w3.shape[0], LANE), w3.dtype).at[:, :1].set(w3)
    b3p = jnp.zeros((1, LANE), b3.dtype).at[:, :1].set(b3)

    # Batch tile: multiple of 8 sublanes; 128 rows fills the MXU (v5e-safe,
    # fine on v6e/v7x; tiny VMEM footprint so no vmem_limit override needed).
    if tb is None:
        tb = 128 if B >= 128 else max(8, ((B + 7) // 8) * 8)
    bp = ((B + tb - 1) // tb) * tb
    if bp != B:
        pad = bp - B
        movie_features = jnp.pad(movie_features, ((0, pad), (0, 0)))
        emb_proj = jnp.pad(emb_proj, ((0, pad), (0, 0)))
    grid = (bp // tb,)

    def row_spec(width):
        return pl.BlockSpec((tb, width), lambda i: (i, 0))

    def const_spec(shape):
        return pl.BlockSpec(shape, lambda i: (0, 0))

    flops = 2 * bp * (F * 64 + 64 * 32 + 32 * LANE)
    bytes_accessed = 4 * (bp * (64 + F + LANE)
                          + F * 64 + 64 + 64 * 32 + 32 + 32 * LANE + LANE)

    out = pl.pallas_call(
        mlp_kernel,
        out_shape=jax.ShapeDtypeStruct((bp, LANE), jnp.float32),
        grid=grid,
        in_specs=[
            row_spec(64),                 # emb_proj tile (streamed per step)
            row_spec(F),                  # movie_features tile
            const_spec(w1_feat.shape),    # weights/biases: VMEM-resident
            const_spec(b1.shape),
            const_spec(w2.shape),
            const_spec(b2.shape),
            const_spec(w3p.shape),
            const_spec(b3p.shape),
        ],
        out_specs=row_spec(LANE),
        compiler_params=pltpu.CompilerParams(
            dimension_semantics=("parallel",)),
        cost_estimate=pl.CostEstimate(
            flops=flops, transcendentals=0, bytes_accessed=bytes_accessed),
    )(emb_proj, movie_features, w1_feat, b1, w2, b2, w3p, b3p)

    return out[:B, :1]


def init_params(key, num_users, num_movie_features, user_embedding_size):
    din = num_movie_features + user_embedding_size
    ks = jax.random.split(key, 7)

    def unif(k, shape, bound):
        return jax.random.uniform(k, shape, jnp.float32, -bound, bound)

    return {
        "user_embedding": jax.random.normal(
            ks[0], (num_users, user_embedding_size), jnp.float32),
        "w1": unif(ks[1], (din, 64), 1.0 / jnp.sqrt(din)),
        "b1": unif(ks[2], (1, 64), 1.0 / jnp.sqrt(din)),
        "w2": unif(ks[3], (64, 32), 1.0 / jnp.sqrt(64.0)),
        "b2": unif(ks[4], (1, 32), 1.0 / jnp.sqrt(64.0)),
        "w3": unif(ks[5], (32, 1), 1.0 / jnp.sqrt(32.0)),
        "b3": unif(ks[6], (1, 1), 1.0 / jnp.sqrt(32.0)),
    }


if __name__ == "__main__":
    # Small, module-consistent shapes.
    batch = 8
    num_users = 16
    num_movie_features = 20
    user_embedding_size = 8

    key = jax.random.PRNGKey(0)
    k_params, k_ids, k_feat = jax.random.split(key, 3)

    params = init_params(k_params, num_users, num_movie_features,
                         user_embedding_size)
    user_ids = jax.random.randint(k_ids, (batch,), 0, num_users,
                                  dtype=jnp.int32)
    movie_features = jax.random.normal(
        k_feat, (batch, num_movie_features), jnp.float32)

    out = net_forward(user_ids, movie_features, params)
    out = jax.block_until_ready(out)

    # Pure-JAX reference (original concat formulation).
    user_emb = jnp.take(params["user_embedding"], user_ids, axis=0)
    x = jnp.concatenate([user_emb, movie_features], axis=1)
    h1 = jnp.maximum(x @ params["w1"] + params["b1"], 0.0)
    h2 = jnp.maximum(h1 @ params["w2"] + params["b2"], 0.0)
    ref = h2 @ params["w3"] + params["b3"]

    assert out.shape == (batch, 1)
    assert jnp.allclose(out, ref, atol=1e-4, rtol=1e-4)

    print("KERNEL_OK")
</pallas_src>

<mosaic_0001>
module attributes {stable_mosaic.version = 11 : i64} {
  func.func @mlp_kernel(%arg0: i32, %arg1: memref<8x64xf32, #tpu.memory_space<vmem>>, %arg2: memref<8x20xf32, #tpu.memory_space<vmem>>, %arg3: memref<20x64xf32, #tpu.memory_space<vmem>>, %arg4: memref<1x64xf32, #tpu.memory_space<vmem>>, %arg5: memref<64x32xf32, #tpu.memory_space<vmem>>, %arg6: memref<1x32xf32, #tpu.memory_space<vmem>>, %arg7: memref<32x128xf32, #tpu.memory_space<vmem>>, %arg8: memref<1x128xf32, #tpu.memory_space<vmem>>, %arg9: memref<8x128xf32, #tpu.memory_space<vmem>>) attributes {dimension_semantics = [#tpu.dimension_semantics<parallel>], iteration_bounds = array<i64: 1>, scalar_prefetch = 0 : i64, scratch_operands = 0 : i64, tpu.core_type = #tpu.core_type<tc>, window_params = [{transform_indices = @transform_0, window_bounds = array<i64: 8, 64>}, {transform_indices = @transform_1, window_bounds = array<i64: 8, 20>}, {pipeline_mode = #tpu.pipeline_mode<synchronous>, transform_indices = @transform_2, window_bounds = array<i64: 20, 64>}, {pipeline_mode = #tpu.pipeline_mode<synchronous>, transform_indices = @transform_3, window_bounds = array<i64: 1, 64>}, {pipeline_mode = #tpu.pipeline_mode<synchronous>, transform_indices = @transform_4, window_bounds = array<i64: 64, 32>}, {pipeline_mode = #tpu.pipeline_mode<synchronous>, transform_indices = @transform_5, window_bounds = array<i64: 1, 32>}, {pipeline_mode = #tpu.pipeline_mode<synchronous>, transform_indices = @transform_6, window_bounds = array<i64: 32, 128>}, {pipeline_mode = #tpu.pipeline_mode<synchronous>, transform_indices = @transform_7, window_bounds = array<i64: 1, 128>}, {transform_indices = @transform_8, window_bounds = array<i64: 8, 128>}]} {
    %c0 = arith.constant 0 : index
    %c0_0 = arith.constant 0 : index
    %0 = vector.load %arg2[%c0, %c0_0] : memref<8x20xf32, #tpu.memory_space<vmem>>, vector<8x20xf32>
    %c0_1 = arith.constant 0 : index
    %c0_2 = arith.constant 0 : index
    %1 = vector.load %arg3[%c0_1, %c0_2] : memref<20x64xf32, #tpu.memory_space<vmem>>, vector<20x64xf32>
    %cst = arith.constant dense<0.000000e+00> : vector<8x64xf32>
    %2 = tpu.matmul %0, %1, %cst {dimension_numbers = #tpu.dot_dimension_numbers<[1], [0], [0], [1], [0, 0, 1, 1], [], []>} : vector<8x20xf32>, vector<20x64xf32>, vector<8x64xf32> -> vector<8x64xf32>
    %c0_3 = arith.constant 0 : index
    %c0_4 = arith.constant 0 : index
    %3 = vector.load %arg1[%c0_3, %c0_4] : memref<8x64xf32, #tpu.memory_space<vmem>>, vector<8x64xf32>
    %4 = arith.addf %2, %3 : vector<8x64xf32>
    %c0_5 = arith.constant 0 : index
    %c0_6 = arith.constant 0 : index
    %5 = vector.load %arg4[%c0_5, %c0_6] : memref<1x64xf32, #tpu.memory_space<vmem>>, vector<1x64xf32>
    %6 = vector.broadcast %5 : vector<1x64xf32> to vector<8x64xf32>
    %7 = arith.addf %4, %6 : vector<8x64xf32>
    %cst_7 = arith.constant 0.000000e+00 : f32
    %8 = vector.broadcast %cst_7 : f32 to vector<8x64xf32>
    %9 = arith.maximumf %7, %8 : vector<8x64xf32>
    %c0_8 = arith.constant 0 : index
    %c0_9 = arith.constant 0 : index
    %10 = vector.load %arg5[%c0_8, %c0_9] : memref<64x32xf32, #tpu.memory_space<vmem>>, vector<64x32xf32>
    %cst_10 = arith.constant dense<0.000000e+00> : vector<8x32xf32>
    %11 = tpu.matmul %9, %10, %cst_10 {dimension_numbers = #tpu.dot_dimension_numbers<[1], [0], [0], [1], [0, 0, 1, 1], [], []>} : vector<8x64xf32>, vector<64x32xf32>, vector<8x32xf32> -> vector<8x32xf32>
    %c0_11 = arith.constant 0 : index
    %c0_12 = arith.constant 0 : index
    %12 = vector.load %arg6[%c0_11, %c0_12] : memref<1x32xf32, #tpu.memory_space<vmem>>, vector<1x32xf32>
    %13 = vector.broadcast %12 : vector<1x32xf32> to vector<8x32xf32>
    %14 = arith.addf %11, %13 : vector<8x32xf32>
    %cst_13 = arith.constant 0.000000e+00 : f32
    %15 = vector.broadcast %cst_13 : f32 to vector<8x32xf32>
    %16 = arith.maximumf %14, %15 : vector<8x32xf32>
    %c0_14 = arith.constant 0 : index
    %c0_15 = arith.constant 0 : index
    %17 = vector.load %arg7[%c0_14, %c0_15] : memref<32x128xf32, #tpu.memory_space<vmem>>, vector<32x128xf32>
    %cst_16 = arith.constant dense<0.000000e+00> : vector<8x128xf32>
    %18 = tpu.matmul %16, %17, %cst_16 {dimension_numbers = #tpu.dot_dimension_numbers<[1], [0], [0], [1], [0, 0, 1, 1], [], []>} : vector<8x32xf32>, vector<32x128xf32>, vector<8x128xf32> -> vector<8x128xf32>
    %c0_17 = arith.constant 0 : index
    %c0_18 = arith.constant 0 : index
    %19 = vector.load %arg8[%c0_17, %c0_18] : memref<1x128xf32, #tpu.memory_space<vmem>>, vector<1x128xf32>
    %20 = vector.broadcast %19 : vector<1x128xf32> to vector<8x128xf32>
    %21 = arith.addf %18, %20 : vector<8x128xf32>
    %c0_19 = arith.constant 0 : index
    %c0_20 = arith.constant 0 : index
    %22 = vector.load %arg9[%c0_19, %c0_20] : memref<8x128xf32, #tpu.memory_space<vmem>>, vector<8x128xf32>
    tpu.vector_store %arg9[%c0_19, %c0_20], %21 {strides = array<i32>} : memref<8x128xf32, #tpu.memory_space<vmem>>, vector<8x128xf32>,
    return
  }
  func.func @transform_0(%arg0: i32) -> (i32, i32) {
    %c0_i32 = arith.constant 0 : i32
    %c0_i32_0 = arith.constant 0 : i32
    return %arg0, %c0_i32 : i32, i32
  }
  func.func @transform_1(%arg0: i32) -> (i32, i32) {
    %c0_i32 = arith.constant 0 : i32
    %c0_i32_0 = arith.constant 0 : i32
    return %arg0, %c0_i32 : i32, i32
  }
  func.func @transform_2(%arg0: i32) -> (i32, i32) {
    %c0_i32 = arith.constant 0 : i32
    %c0_i32_0 = arith.constant 0 : i32
    %c0_i32_1 = arith.constant 0 : i32
    return %c0_i32, %c0_i32_0 : i32, i32
  }
  func.func @transform_3(%arg0: i32) -> (i32, i32) {
    %c0_i32 = arith.constant 0 : i32
    %c0_i32_0 = arith.constant 0 : i32
    %c0_i32_1 = arith.constant 0 : i32
    return %c0_i32, %c0_i32_0 : i32, i32
  }
  func.func @transform_4(%arg0: i32) -> (i32, i32) {
    %c0_i32 = arith.constant 0 : i32
    %c0_i32_0 = arith.constant 0 : i32
    %c0_i32_1 = arith.constant 0 : i32
    return %c0_i32, %c0_i32_0 : i32, i32
  }
  func.func @transform_5(%arg0: i32) -> (i32, i32) {
    %c0_i32 = arith.constant 0 : i32
    %c0_i32_0 = arith.constant 0 : i32
    %c0_i32_1 = arith.constant 0 : i32
    return %c0_i32, %c0_i32_0 : i32, i32
  }
  func.func @transform_6(%arg0: i32) -> (i32, i32) {
    %c0_i32 = arith.constant 0 : i32
    %c0_i32_0 = arith.constant 0 : i32
    %c0_i32_1 = arith.constant 0 : i32
    return %c0_i32, %c0_i32_0 : i32, i32
  }
  func.func @transform_7(%arg0: i32) -> (i32, i32) {
    %c0_i32 = arith.constant 0 : i32
    %c0_i32_0 = arith.constant 0 : i32
    %c0_i32_1 = arith.constant 0 : i32
    return %c0_i32, %c0_i32_0 : i32, i32
  }
  func.func @transform_8(%arg0: i32) -> (i32, i32) {
    %c0_i32 = arith.constant 0 : i32
    %c0_i32_0 = arith.constant 0 : i32
    return %arg0, %c0_i32 : i32, i32
  }
}

</mosaic_0001>

<bundles_post_ra>
// kernel: tpu_custom_call.1
= control target key start
LH: loop header
LB: loop body
LE: loop exit
PB: predicated region body
PF: predicated region fallthrough
CT: control target
= control target key end

     0   :  { %vm39_vm0 = vcmask 1043456   ;;  %v401_v1 = vmov 0.0   ;;  %vm402_vm1 = vmmov 0   ;;  %s515_s0 = inlined_call_operand.vmem [shape: f32[8,64], index: 0, kind: input, shape index: {}]   ;;  %s516_s1 = inlined_call_operand.vmem [shape: f32[8,20], index: 1, kind: input, shape index: {}]   ;;  %s517_s2 = inlined_call_operand.vmem [shape: f32[20,64], index: 2, kind: input, shape index: {}]   ;;  %s518_s3 = inlined_call_operand.vmem [shape: f32[1,64], index: 3, kind: input, shape index: {}]   ;;  %s519_s4 = inlined_call_operand.vmem [shape: f32[64,32], index: 4, kind: input, shape index: {}]   ;;  %s520_s5 = inlined_call_operand.vmem [shape: f32[1,32], index: 5, kind: input, shape index: {}]   ;;  %s521_s6 = inlined_call_operand.vmem [shape: f32[32,128], index: 6, kind: input, shape index: {}]   ;;  %s522_s7 = inlined_call_operand.vmem [shape: f32[1,128], index: 7, kind: input, shape index: {}]   ;;  %s523_s8 = inlined_call_operand.hbm [shape: f32[8,128], index: 8, kind: output, shape index: {}]  }
   0x1   :  { %v33_v0 = vld [vmem:[%s517_s2 + $0x10] sm:$0xf]  ;;  %337 = vmatprep.subr.mxu0 %v401_v1  ;;  %v32_v2 = vld [vmem:[%s517_s2 + $0x8] sm:$0xff]  ;;  %346 = vmatprep.subr.mxu1 %v401_v1  ;;  %v129_v3 = vld [vmem:[%s519_s4 + $0x38] sm:$0xff] }
   0x2   :  { %338 = vmatpush3.msk.msra.mxu0 %vm39_vm0, %v33_v0  ;;  %343 = vmatprep.mubr.msk.f32.mxu0 %vm402_vm1, %v401_v1  ;;  %v128_v4 = vld [vmem:[%s519_s4 + $0x30] sm:$0xff]  ;;  %v31_v5 = vld [vmem:[%s517_s2] sm:$0xff] }
   0x3   :  { %339 = vmatprep.subr.mxu0 %v401_v1  ;;  %347 = vmatpush3.msra.mxu1 %v129_v3 }
   0x4   :  { %13 = vsyncpa [#allocation3], 0  ;;  %340 = vmatpush3.msra.mxu0 %v32_v2  ;;  %v30_v6 = vld [vmem:[%s516_s1] sm:$0xff]  ;;  %vm35_vm2 = vcmask 162816   ;;  %348 = vmatprep.subr.mxu1 %v401_v1  ;;  %v127_v7 = vld [vmem:[%s519_s4 + $0x28] sm:$0xff]  ;;  %vm137_vm3 = vcmask 523264  }
   0x5   :  { %341 = vmatprep.subr.mxu0 %v401_v1  ;;  %349 = vmatpush3.msra.mxu1 %v128_v4  ;;  %v126_v8 = vld [vmem:[%s519_s4 + $0x20] sm:$0xff]  ;;  %v125_v9 = vld [vmem:[%s519_s4 + $0x18] sm:$0xff]  ;;  %v124_v10 = vld [vmem:[%s519_s4 + $0x10] sm:$0xff]  ;;  %vm223_vm4 = vcmask 261120   ;;  %s403_s18 = smov [#allocation2]  }
   0x6   :  { %342 = vmatpush3.msra.mxu0 %v31_v5  ;;  %350 = vmatprep.subr.mxu1 %v401_v1  ;;  %v123_v11 = vld [vmem:[%s519_s4 + $0x8] sm:$0xff]  ;;  %v122_v12 = vld [vmem:[%s519_s4] sm:$0xff]  ;;  %v215_v13 = vld [vmem:[%s521_s6 + $0x18] sm:$0xff]  ;;  %s304_s19 = sshll.u32 %s403_s18, 4  ;;  %s305_s19 = int_to_ptr.vmem [resolvable:$true] %s304_s19 }
   0x7   :  { %344 = vmatmul.mubr.msk.f32.vlgmr.msra.gmra.mxu0 %vm35_vm2, %v30_v6  ;;  %351 = vmatpush3.msra.mxu1 %v127_v7  ;;  %v34_v14 = vld [vmem:[%s515_s0] sm:$0xff]  ;;  %v214_v21 = vld [vmem:[%s521_s6 + $0x10] sm:$0xff]  ;;  %v213_v22 = vld [vmem:[%s521_s6 + $0x8] sm:$0xff]  ;;  %p384_p1 = scmp.lt.s32.totalorder %s305_s19, %s305_s19 }
   0x8   :  { %352 = vmatprep.subr.mxu1 %v401_v1  ;;  %362 = vmatprep.mubr.msk.f32.mxu1 %vm402_vm1, %v401_v1  ;;  %v314_v16 = vld [vmem:[%s518_s3] ss:$0 sm:$0xff] }
   0x9   :  { %353 = vmatpush3.msra.mxu1 %v126_v8  ;;  %365 = vmatprep.subr.mxu0 %v401_v1  ;;  %v212_v23 = vld [vmem:[%s521_s6] sm:$0xff]  ;;  %s379_s6 = scalar_lea.vmem %s305_s19, 128 }
   0xa   :  { %354 = vmatprep.subr.mxu1 %v401_v1  ;;  %373 = vmatprep.mubr.msk.f32.mxu0 %vm402_vm1, %v401_v1  ;;  %v315_v24 = vld [vmem:[%s520_s5] ss:$0 sm:$0xff]  ;;  %p380_p0 = scmp.ne.s32.totalorder %s305_s19, %s379_s6  ;;  %p385_p2 = scmp.lt.s32.totalorder %s379_s6, %s379_s6 }
   0xb   :  { %355 = vmatpush3.msra.mxu1 %v125_v9  ;;  %366 = vmatpush3.msra.mxu0 %v215_v13  ;;  %v317_v29 = vld [vmem:[%s522_s7] ss:$0 sm:$0xff] }
   0xc   :  { %356 = vmatprep.subr.mxu1 %v401_v1  ;;  %367 = vmatprep.subr.mxu0 %v401_v1  ;;  %p386_p3 = por %p385_p2, %p384_p1 }
   0xd   :  { %357 = vmatpush3.msra.mxu1 %v124_v10  ;;  %368 = vmatpush3.msra.mxu0 %v214_v21 }
   0xe   :  { %358 = vmatprep.subr.mxu1 %v401_v1  ;;  %369 = vmatprep.subr.mxu0 %v401_v1  ;;  %p387_p4 = pnand %p386_p3, %p380_p0 }
   0xf   :  { %359 = vmatpush3.msra.mxu1 %v123_v11  ;;  %370 = vmatpush3.msra.mxu0 %v213_v22 }
  0x10   :  { %360 = vmatprep.subr.mxu1 %v401_v1  ;;  %371 = vmatprep.subr.mxu0 %v401_v1 }
  0x11   :  { %361 = vmatpush3.msra.mxu1 %v122_v12  ;;  %372 = vmatpush3.msra.mxu0 %v212_v23 }
  0xc7   :  { %v109_v15 = vpop.f32.mrf.mxu0 }
  0xc8   :  { %v110_v17 = vadd.f32 %v109_v15, %v34_v14 }
  0xc9   :  { %v345_v18 = vpop.f32.mrf.mxu0 }
  0xca   :  { %v120_v19 = vadd.f32 %v314_v16, %v110_v17 }
  0xcc   :  { %v121_v20 = vmax.f32 %v120_v19, 0.0 }
  0xce   :  { %363 = vmatmul.mubr.msk.f32.vlgmr.msra.gmra.mxu1 %vm137_vm3, %v121_v20 }
 0x18e   :  { %v207_v25 = vpop.f32.mrf.mxu1 }
 0x18f   :  { %v208_v26 = vadd.f32 %v315_v24, %v207_v25 }
 0x190   :  { %v364_v27 = vpop.f32.mrf.mxu1 }
 0x191   :  { %v211_v28 = vmax.f32 %v208_v26, 0.0 }
 0x193   :  { %374 = vmatmul.mubr.msk.f32.vlgmr.msra.gmra.mxu0 %vm223_vm4, %v211_v28 }
 0x253   :  { %v293_v30 = vpop.f32.mrf.mxu0 }
 0x254   :  { %v294_v31 = vadd.f32 %v317_v29, %v293_v30 }
 0x255   :  { %v375_v32 = vpop.f32.mrf.mxu0 }
 0x256   :  { %297 = vst [vmem:[#allocation2] sm:$0xff] %v294_v31 }
 0x257   :  { %390 = shalt.err (!%p387_p4)
}
 0x258   :  { %307 = dma.vmem_to_hbm [thread:$0]  %s305_s19, 128, %s523_s8, [#allocation3]  }
 0x259   :  { %399 = dma.done.wait [#allocation3], 128  }
 0x25a   :  { %400 = vsyncadd [#allocation3], 4294967168 }
 0x25b   :  { %311 = vsyncpa [#allocation3], 1 }

</bundles_post_ra>
